<compile_context>
chip_gen: v7x
topology: tpu7x:2x2x1
jax: 0.10.0
libtpu: 0.0.40
codegen_flags: <defaults>
</compile_context>

<pallas_src>
import functools

import numpy as np
import jax
import jax.numpy as jnp
from jax.experimental import pallas as pl
from jax.experimental.pallas import tpu as pltpu

LANE = 128
SUBLANE = 8


def _round_up(n, m):
    return ((n + m - 1) // m) * m


# --------------------------------- kernel ---------------------------------

def _noisy_layer(h, w_ref, ein_ref, vec_ref, compute_dtype):
    """One NoisyLinear layer on VMEM-resident operands.

    w_ref:   (2, in, out)  -> [w_mu.T, w_sigma.T]
    ein_ref: (in, 1)       -> eps_in column
    vec_ref: (3, out)      -> [eps_out, bias_mu, bias_sigma]
    """
    eps_out = vec_ref[0:1, :]                              # (1, out)
    bias = vec_ref[1:2, :] + vec_ref[2:3, :] * eps_out     # (1, out), f32
    # Rank-1 outer product eps_in ⊗ eps_out as a VPU broadcast (no HBM matrix).
    w_eps = ein_ref[...] * eps_out                          # (in, out)
    w_eff = w_ref[0] + w_ref[1] * w_eps                     # (in, out), f32 combine
    y = jnp.dot(h.astype(compute_dtype), w_eff.astype(compute_dtype),
                preferred_element_type=jnp.float32)
    return y + bias


def noisy_mlp_kernel(x_ref,
                     w1, e1, v1,
                     w2, e2, v2,
                     w3, e3, v3,
                     o_ref, *, compute_dtype):
    h = x_ref[...]                                          # (TB, D_in_pad) f32
    h = jnp.maximum(_noisy_layer(h, w1, e1, v1, compute_dtype), 0.0)
    h = jnp.maximum(_noisy_layer(h, w2, e2, v2, compute_dtype), 0.0)
    out = _noisy_layer(h, w3, e3, v3, compute_dtype)
    o_ref[...] = out.astype(o_ref.dtype)


# --------------------------------- wrapper ---------------------------------

def _resident_spec(shape):
    """Weight operand: full-array block, same block at every grid step."""
    if len(shape) == 3:
        return pl.BlockSpec(shape, lambda i: (0, 0, 0))
    assert len(shape) == 2
    return pl.BlockSpec(shape, lambda i: (0, 0))


def noisy_network_forward(x, packed, *, compute_dtype=jnp.float32, batch_tile=128):
    """x: (B, d_in) float32.  packed: output of pack_network_params()."""
    B, d_in = x.shape
    d_in_p = packed["w1"].shape[1]
    h_p = packed["w1"].shape[2]
    d_out_p = packed["w3"].shape[2]
    d_out = packed["d_out"]
    assert d_in <= d_in_p

    # Batch padding / tiling: sublane-dense, tiled along a parallel grid axis.
    if B <= batch_tile:
        TB = _round_up(B, SUBLANE)
        B_pad = TB
    else:
        TB = batch_tile
        B_pad = _round_up(B, TB)

    x_p = jnp.zeros((B_pad, d_in_p), jnp.float32).at[:B, :d_in].set(x)

    weights = [packed["w1"], packed["e1"], packed["v1"],
               packed["w2"], packed["e2"], packed["v2"],
               packed["w3"], packed["e3"], packed["v3"]]

    x_spec = pl.BlockSpec((TB, d_in_p), lambda i: (i, 0))
    out_spec = pl.BlockSpec((TB, d_out_p), lambda i: (i, 0))

    flops = 2 * B_pad * (d_in_p * h_p + h_p * h_p + h_p * d_out_p)
    bytes_accessed = int(
        x_p.size * x_p.dtype.itemsize
        + sum(int(a.size) * a.dtype.itemsize for a in weights)
        + B_pad * d_out_p * 4
    )

    out = pl.pallas_call(
        functools.partial(noisy_mlp_kernel, compute_dtype=compute_dtype),
        out_shape=jax.ShapeDtypeStruct((B_pad, d_out_p), jnp.float32),
        grid=(B_pad // TB,),
        in_specs=[x_spec] + [_resident_spec(a.shape) for a in weights],
        out_specs=out_spec,
        compiler_params=pltpu.CompilerParams(
            dimension_semantics=("parallel",),
            vmem_limit_bytes=64 * 1024 * 1024,
        ),
        cost_estimate=pl.CostEstimate(
            flops=flops, transcendentals=0, bytes_accessed=bytes_accessed),
    )(x_p, *weights)

    return out[:B, :d_out]


# ---------------- deterministic parameter construction (mirrors __init__) ----------------

def _scale_noise(key, size):
    # torch: x = randn(size); return sign(x) * sqrt(|x|)
    x = jax.random.normal(key, (size,), dtype=jnp.float32)
    return jnp.sign(x) * jnp.sqrt(jnp.abs(x))


def make_noisy_linear_params(key, in_features, out_features, std_init=0.4):
    k_wmu, k_bmu, k_ein, k_eout = jax.random.split(key, 4)
    mu_range = 1.0 / np.sqrt(in_features)
    return dict(
        w_mu=jax.random.uniform(k_wmu, (out_features, in_features),
                                jnp.float32, -mu_range, mu_range),
        w_sigma=jnp.full((out_features, in_features),
                         std_init / np.sqrt(in_features), jnp.float32),
        b_mu=jax.random.uniform(k_bmu, (out_features,),
                                jnp.float32, -mu_range, mu_range),
        b_sigma=jnp.full((out_features,),
                         std_init / np.sqrt(out_features), jnp.float32),
        eps_in=_scale_noise(k_ein, in_features),      # factorized noise kept rank-1
        eps_out=_scale_noise(k_eout, out_features),
    )


def make_network_params(key, input_dim, output_dim, hidden=64):
    k1, k2, k3 = jax.random.split(key, 3)
    return [make_noisy_linear_params(k1, input_dim, hidden),
            make_noisy_linear_params(k2, hidden, hidden),
            make_noisy_linear_params(k3, hidden, output_dim)]


def _pack_layer(p, in_pad, out_pad):
    out_f, in_f = p["w_mu"].shape
    w = jnp.zeros((2, in_pad, out_pad), jnp.float32)
    w = w.at[0, :in_f, :out_f].set(p["w_mu"].T)     # zero padding keeps valid lanes exact
    w = w.at[1, :in_f, :out_f].set(p["w_sigma"].T)
    e = jnp.zeros((in_pad, 1), jnp.float32).at[:in_f, 0].set(p["eps_in"])
    v = jnp.zeros((3, out_pad), jnp.float32)
    v = v.at[0, :out_f].set(p["eps_out"])
    v = v.at[1, :out_f].set(p["b_mu"])
    v = v.at[2, :out_f].set(p["b_sigma"])
    return w, e, v


def pack_network_params(layers):
    l1, l2, l3 = layers
    d_in = l1["w_mu"].shape[1]
    hidden = l1["w_mu"].shape[0]
    d_out = l3["w_mu"].shape[0]
    d_in_p, h_p, d_out_p = (_round_up(d_in, LANE), _round_up(hidden, LANE),
                            _round_up(d_out, LANE))
    w1, e1, v1 = _pack_layer(l1, d_in_p, h_p)
    w2, e2, v2 = _pack_layer(l2, h_p, h_p)
    w3, e3, v3 = _pack_layer(l3, h_p, d_out_p)
    return dict(w1=w1, e1=e1, v1=v1, w2=w2, e2=e2, v2=v2, w3=w3, e3=e3, v3=v3,
                d_out=d_out)


# --------------------------------- reference ---------------------------------

def reference_forward(x, layers):
    def lin(h, p):
        w_eps = jnp.outer(p["eps_out"], p["eps_in"])              # (out, in)
        w = p["w_mu"] + p["w_sigma"] * w_eps
        b = p["b_mu"] + p["b_sigma"] * p["eps_out"]
        return h @ w.T + b
    h = jnp.maximum(lin(x, layers[0]), 0.0)
    h = jnp.maximum(lin(h, layers[1]), 0.0)
    return lin(h, layers[2])


if __name__ == "__main__":
    key = jax.random.PRNGKey(0)
    k_x, k_p = jax.random.split(key)

    batch, input_dim, output_dim = 8, 32, 16
    x = jax.random.normal(k_x, (batch, input_dim), dtype=jnp.float32)
    layers = make_network_params(k_p, input_dim, output_dim)
    packed = pack_network_params(layers)

    ref = reference_forward(x, layers)

    # f32 path: exact semantics.
    out_f32 = jax.block_until_ready(
        noisy_network_forward(x, packed, compute_dtype=jnp.float32))
    np.testing.assert_allclose(np.asarray(out_f32), np.asarray(ref),
                               rtol=1e-5, atol=1e-5)

    # bf16 compute path (MXU peak on v5e/v6e/v7x): f32 noise combine + f32
    # accumulation, bf16 matmul operands -> looser tolerance.
    out_bf16 = jax.block_until_ready(
        noisy_network_forward(x, packed, compute_dtype=jnp.bfloat16))
    np.testing.assert_allclose(np.asarray(out_bf16), np.asarray(ref),
                               rtol=5e-2, atol=5e-2)

    print("KERNEL_OK")
</pallas_src>

<mosaic_0001>
module attributes {stable_mosaic.version = 11 : i64} {
  func.func @noisy_mlp_kernel(%arg0: i32, %arg1: memref<8x128xf32, #tpu.memory_space<vmem>>, %arg2: memref<2x128x128xf32, #tpu.memory_space<vmem>>, %arg3: memref<128x1xf32, #tpu.memory_space<vmem>>, %arg4: memref<3x128xf32, #tpu.memory_space<vmem>>, %arg5: memref<2x128x128xf32, #tpu.memory_space<vmem>>, %arg6: memref<128x1xf32, #tpu.memory_space<vmem>>, %arg7: memref<3x128xf32, #tpu.memory_space<vmem>>, %arg8: memref<2x128x128xf32, #tpu.memory_space<vmem>>, %arg9: memref<128x1xf32, #tpu.memory_space<vmem>>, %arg10: memref<3x128xf32, #tpu.memory_space<vmem>>, %arg11: memref<8x128xf32, #tpu.memory_space<vmem>>) attributes {dimension_semantics = [#tpu.dimension_semantics<parallel>], iteration_bounds = array<i64: 1>, scalar_prefetch = 0 : i64, scratch_operands = 0 : i64, tpu.core_type = #tpu.core_type<tc>, window_params = [{transform_indices = @transform_0, window_bounds = array<i64: 8, 128>}, {pipeline_mode = #tpu.pipeline_mode<synchronous>, transform_indices = @transform_1, window_bounds = array<i64: 2, 128, 128>}, {pipeline_mode = #tpu.pipeline_mode<synchronous>, transform_indices = @transform_2, window_bounds = array<i64: 128, 1>}, {pipeline_mode = #tpu.pipeline_mode<synchronous>, transform_indices = @transform_3, window_bounds = array<i64: 3, 128>}, {pipeline_mode = #tpu.pipeline_mode<synchronous>, transform_indices = @transform_4, window_bounds = array<i64: 2, 128, 128>}, {pipeline_mode = #tpu.pipeline_mode<synchronous>, transform_indices = @transform_5, window_bounds = array<i64: 128, 1>}, {pipeline_mode = #tpu.pipeline_mode<synchronous>, transform_indices = @transform_6, window_bounds = array<i64: 3, 128>}, {pipeline_mode = #tpu.pipeline_mode<synchronous>, transform_indices = @transform_7, window_bounds = array<i64: 2, 128, 128>}, {pipeline_mode = #tpu.pipeline_mode<synchronous>, transform_indices = @transform_8, window_bounds = array<i64: 128, 1>}, {pipeline_mode = #tpu.pipeline_mode<synchronous>, transform_indices = @transform_9, window_bounds = array<i64: 3, 128>}, {transform_indices = @transform_10, window_bounds = array<i64: 8, 128>}]} {
    %c0 = arith.constant 0 : index
    %c0_0 = arith.constant 0 : index
    %0 = vector.load %arg1[%c0, %c0_0] : memref<8x128xf32, #tpu.memory_space<vmem>>, vector<8x128xf32>
    %c0_1 = arith.constant 0 : index
    %c0_2 = arith.constant 0 : index
    %1 = vector.load %arg4[%c0_1, %c0_2] : memref<3x128xf32, #tpu.memory_space<vmem>>, vector<1x128xf32>
    %c1 = arith.constant 1 : index
    %c0_3 = arith.constant 0 : index
    %2 = vector.load %arg4[%c1, %c0_3] : memref<3x128xf32, #tpu.memory_space<vmem>>, vector<1x128xf32>
    %c2 = arith.constant 2 : index
    %c0_4 = arith.constant 0 : index
    %3 = vector.load %arg4[%c2, %c0_4] : memref<3x128xf32, #tpu.memory_space<vmem>>, vector<1x128xf32>
    %4 = arith.mulf %3, %1 : vector<1x128xf32>
    %5 = arith.addf %2, %4 : vector<1x128xf32>
    %c0_5 = arith.constant 0 : index
    %c0_6 = arith.constant 0 : index
    %6 = vector.load %arg3[%c0_5, %c0_6] : memref<128x1xf32, #tpu.memory_space<vmem>>, vector<128x1xf32>
    %7 = vector.broadcast %6 : vector<128x1xf32> to vector<128x128xf32>
    %8 = vector.broadcast %1 : vector<1x128xf32> to vector<128x128xf32>
    %9 = arith.mulf %7, %8 : vector<128x128xf32>
    %c0_7 = arith.constant 0 : index
    %c0_8 = arith.constant 0 : index
    %c0_9 = arith.constant 0 : index
    %10 = vector.load %arg2[%c0_7, %c0_8, %c0_9] : memref<2x128x128xf32, #tpu.memory_space<vmem>>, vector<1x128x128xf32>
    %11 = vector.shape_cast %10 : vector<1x128x128xf32> to vector<128x128xf32>
    %c1_10 = arith.constant 1 : index
    %c0_11 = arith.constant 0 : index
    %c0_12 = arith.constant 0 : index
    %12 = vector.load %arg2[%c1_10, %c0_11, %c0_12] : memref<2x128x128xf32, #tpu.memory_space<vmem>>, vector<1x128x128xf32>
    %13 = vector.shape_cast %12 : vector<1x128x128xf32> to vector<128x128xf32>
    %14 = arith.mulf %13, %9 : vector<128x128xf32>
    %15 = arith.addf %11, %14 : vector<128x128xf32>
    %cst = arith.constant dense<0.000000e+00> : vector<8x128xf32>
    %16 = tpu.matmul %0, %15, %cst {dimension_numbers = #tpu.dot_dimension_numbers<[1], [0], [0], [1], [0, 0, 1, 1], [], []>} : vector<8x128xf32>, vector<128x128xf32>, vector<8x128xf32> -> vector<8x128xf32>
    %17 = vector.broadcast %5 : vector<1x128xf32> to vector<8x128xf32>
    %18 = arith.addf %16, %17 : vector<8x128xf32>
    %cst_13 = arith.constant 0.000000e+00 : f32
    %19 = vector.broadcast %cst_13 : f32 to vector<8x128xf32>
    %20 = arith.maximumf %18, %19 : vector<8x128xf32>
    %c0_14 = arith.constant 0 : index
    %c0_15 = arith.constant 0 : index
    %21 = vector.load %arg7[%c0_14, %c0_15] : memref<3x128xf32, #tpu.memory_space<vmem>>, vector<1x128xf32>
    %c1_16 = arith.constant 1 : index
    %c0_17 = arith.constant 0 : index
    %22 = vector.load %arg7[%c1_16, %c0_17] : memref<3x128xf32, #tpu.memory_space<vmem>>, vector<1x128xf32>
    %c2_18 = arith.constant 2 : index
    %c0_19 = arith.constant 0 : index
    %23 = vector.load %arg7[%c2_18, %c0_19] : memref<3x128xf32, #tpu.memory_space<vmem>>, vector<1x128xf32>
    %24 = arith.mulf %23, %21 : vector<1x128xf32>
    %25 = arith.addf %22, %24 : vector<1x128xf32>
    %c0_20 = arith.constant 0 : index
    %c0_21 = arith.constant 0 : index
    %26 = vector.load %arg6[%c0_20, %c0_21] : memref<128x1xf32, #tpu.memory_space<vmem>>, vector<128x1xf32>
    %27 = vector.broadcast %26 : vector<128x1xf32> to vector<128x128xf32>
    %28 = vector.broadcast %21 : vector<1x128xf32> to vector<128x128xf32>
    %29 = arith.mulf %27, %28 : vector<128x128xf32>
    %c0_22 = arith.constant 0 : index
    %c0_23 = arith.constant 0 : index
    %c0_24 = arith.constant 0 : index
    %30 = vector.load %arg5[%c0_22, %c0_23, %c0_24] : memref<2x128x128xf32, #tpu.memory_space<vmem>>, vector<1x128x128xf32>
    %31 = vector.shape_cast %30 : vector<1x128x128xf32> to vector<128x128xf32>
    %c1_25 = arith.constant 1 : index
    %c0_26 = arith.constant 0 : index
    %c0_27 = arith.constant 0 : index
    %32 = vector.load %arg5[%c1_25, %c0_26, %c0_27] : memref<2x128x128xf32, #tpu.memory_space<vmem>>, vector<1x128x128xf32>
    %33 = vector.shape_cast %32 : vector<1x128x128xf32> to vector<128x128xf32>
    %34 = arith.mulf %33, %29 : vector<128x128xf32>
    %35 = arith.addf %31, %34 : vector<128x128xf32>
    %cst_28 = arith.constant dense<0.000000e+00> : vector<8x128xf32>
    %36 = tpu.matmul %20, %35, %cst_28 {dimension_numbers = #tpu.dot_dimension_numbers<[1], [0], [0], [1], [0, 0, 1, 1], [], []>} : vector<8x128xf32>, vector<128x128xf32>, vector<8x128xf32> -> vector<8x128xf32>
    %37 = vector.broadcast %25 : vector<1x128xf32> to vector<8x128xf32>
    %38 = arith.addf %36, %37 : vector<8x128xf32>
    %cst_29 = arith.constant 0.000000e+00 : f32
    %39 = vector.broadcast %cst_29 : f32 to vector<8x128xf32>
    %40 = arith.maximumf %38, %39 : vector<8x128xf32>
    %c0_30 = arith.constant 0 : index
    %c0_31 = arith.constant 0 : index
    %41 = vector.load %arg10[%c0_30, %c0_31] : memref<3x128xf32, #tpu.memory_space<vmem>>, vector<1x128xf32>
    %c1_32 = arith.constant 1 : index
    %c0_33 = arith.constant 0 : index
    %42 = vector.load %arg10[%c1_32, %c0_33] : memref<3x128xf32, #tpu.memory_space<vmem>>, vector<1x128xf32>
    %c2_34 = arith.constant 2 : index
    %c0_35 = arith.constant 0 : index
    %43 = vector.load %arg10[%c2_34, %c0_35] : memref<3x128xf32, #tpu.memory_space<vmem>>, vector<1x128xf32>
    %44 = arith.mulf %43, %41 : vector<1x128xf32>
    %45 = arith.addf %42, %44 : vector<1x128xf32>
    %c0_36 = arith.constant 0 : index
    %c0_37 = arith.constant 0 : index
    %46 = vector.load %arg9[%c0_36, %c0_37] : memref<128x1xf32, #tpu.memory_space<vmem>>, vector<128x1xf32>
    %47 = vector.broadcast %46 : vector<128x1xf32> to vector<128x128xf32>
    %48 = vector.broadcast %41 : vector<1x128xf32> to vector<128x128xf32>
    %49 = arith.mulf %47, %48 : vector<128x128xf32>
    %c0_38 = arith.constant 0 : index
    %c0_39 = arith.constant 0 : index
    %c0_40 = arith.constant 0 : index
    %50 = vector.load %arg8[%c0_38, %c0_39, %c0_40] : memref<2x128x128xf32, #tpu.memory_space<vmem>>, vector<1x128x128xf32>
    %51 = vector.shape_cast %50 : vector<1x128x128xf32> to vector<128x128xf32>
    %c1_41 = arith.constant 1 : index
    %c0_42 = arith.constant 0 : index
    %c0_43 = arith.constant 0 : index
    %52 = vector.load %arg8[%c1_41, %c0_42, %c0_43] : memref<2x128x128xf32, #tpu.memory_space<vmem>>, vector<1x128x128xf32>
    %53 = vector.shape_cast %52 : vector<1x128x128xf32> to vector<128x128xf32>
    %54 = arith.mulf %53, %49 : vector<128x128xf32>
    %55 = arith.addf %51, %54 : vector<128x128xf32>
    %cst_44 = arith.constant dense<0.000000e+00> : vector<8x128xf32>
    %56 = tpu.matmul %40, %55, %cst_44 {dimension_numbers = #tpu.dot_dimension_numbers<[1], [0], [0], [1], [0, 0, 1, 1], [], []>} : vector<8x128xf32>, vector<128x128xf32>, vector<8x128xf32> -> vector<8x128xf32>
    %57 = vector.broadcast %45 : vector<1x128xf32> to vector<8x128xf32>
    %58 = arith.addf %56, %57 : vector<8x128xf32>
    %c0_45 = arith.constant 0 : index
    %c0_46 = arith.constant 0 : index
    %59 = vector.load %arg11[%c0_45, %c0_46] : memref<8x128xf32, #tpu.memory_space<vmem>>, vector<8x128xf32>
    tpu.vector_store %arg11[%c0_45, %c0_46], %58 {strides = array<i32>} : memref<8x128xf32, #tpu.memory_space<vmem>>, vector<8x128xf32>,
    return
  }
  func.func @transform_0(%arg0: i32) -> (i32, i32) {
    %c0_i32 = arith.constant 0 : i32
    %c0_i32_0 = arith.constant 0 : i32
    return %arg0, %c0_i32 : i32, i32
  }
  func.func @transform_1(%arg0: i32) -> (i32, i32, i32) {
    %c0_i32 = arith.constant 0 : i32
    %c0_i32_0 = arith.constant 0 : i32
    %c0_i32_1 = arith.constant 0 : i32
    %c0_i32_2 = arith.constant 0 : i32
    return %c0_i32, %c0_i32_0, %c0_i32_1 : i32, i32, i32
  }
  func.func @transform_2(%arg0: i32) -> (i32, i32) {
    %c0_i32 = arith.constant 0 : i32
    %c0_i32_0 = arith.constant 0 : i32
    %c0_i32_1 = arith.constant 0 : i32
    return %c0_i32, %c0_i32_0 : i32, i32
  }
  func.func @transform_3(%arg0: i32) -> (i32, i32) {
    %c0_i32 = arith.constant 0 : i32
    %c0_i32_0 = arith.constant 0 : i32
    %c0_i32_1 = arith.constant 0 : i32
    return %c0_i32, %c0_i32_0 : i32, i32
  }
  func.func @transform_4(%arg0: i32) -> (i32, i32, i32) {
    %c0_i32 = arith.constant 0 : i32
    %c0_i32_0 = arith.constant 0 : i32
    %c0_i32_1 = arith.constant 0 : i32
    %c0_i32_2 = arith.constant 0 : i32
    return %c0_i32, %c0_i32_0, %c0_i32_1 : i32, i32, i32
  }
  func.func @transform_5(%arg0: i32) -> (i32, i32) {
    %c0_i32 = arith.constant 0 : i32
    %c0_i32_0 = arith.constant 0 : i32
    %c0_i32_1 = arith.constant 0 : i32
    return %c0_i32, %c0_i32_0 : i32, i32
  }
  func.func @transform_6(%arg0: i32) -> (i32, i32) {
    %c0_i32 = arith.constant 0 : i32
    %c0_i32_0 = arith.constant 0 : i32
    %c0_i32_1 = arith.constant 0 : i32
    return %c0_i32, %c0_i32_0 : i32, i32
  }
  func.func @transform_7(%arg0: i32) -> (i32, i32, i32) {
    %c0_i32 = arith.constant 0 : i32
    %c0_i32_0 = arith.constant 0 : i32
    %c0_i32_1 = arith.constant 0 : i32
    %c0_i32_2 = arith.constant 0 : i32
    return %c0_i32, %c0_i32_0, %c0_i32_1 : i32, i32, i32
  }
  func.func @transform_8(%arg0: i32) -> (i32, i32) {
    %c0_i32 = arith.constant 0 : i32
    %c0_i32_0 = arith.constant 0 : i32
    %c0_i32_1 = arith.constant 0 : i32
    return %c0_i32, %c0_i32_0 : i32, i32
  }
  func.func @transform_9(%arg0: i32) -> (i32, i32) {
    %c0_i32 = arith.constant 0 : i32
    %c0_i32_0 = arith.constant 0 : i32
    %c0_i32_1 = arith.constant 0 : i32
    return %c0_i32, %c0_i32_0 : i32, i32
  }
  func.func @transform_10(%arg0: i32) -> (i32, i32) {
    %c0_i32 = arith.constant 0 : i32
    %c0_i32_0 = arith.constant 0 : i32
    return %arg0, %c0_i32 : i32, i32
  }
}

</mosaic_0001>

<bundles_post_ra>
// kernel: tpu_custom_call.1
= control target key start
LH: loop header
LB: loop body
LE: loop exit
PB: predicated region body
PF: predicated region fallthrough
CT: control target
= control target key end

     0   :  { %15 = vsyncpa [#allocation3], 0  ;;  %s1797_s0 = inlined_call_operand.hbm [shape: f32[8,128], index: 0, kind: input, shape index: {}]   ;;  %s1798_s1 = inlined_call_operand.hbm [shape: f32[2,128,128], index: 1, kind: input, shape index: {}]   ;;  %s1799_s2 = inlined_call_operand.hbm [shape: f32[128,1], index: 2, kind: input, shape index: {}]   ;;  %s1800_s3 = inlined_call_operand.hbm [shape: f32[3,128], index: 3, kind: input, shape index: {}]   ;;  %s1801_s4 = inlined_call_operand.hbm [shape: f32[2,128,128], index: 4, kind: input, shape index: {}]   ;;  %s1802_s5 = inlined_call_operand.hbm [shape: f32[128,1], index: 5, kind: input, shape index: {}]   ;;  %s1803_s6 = inlined_call_operand.hbm [shape: f32[3,128], index: 6, kind: input, shape index: {}]   ;;  %s1804_s7 = inlined_call_operand.hbm [shape: f32[2,128,128], index: 7, kind: input, shape index: {}]   ;;  %s1805_s8 = inlined_call_operand.hbm [shape: f32[128,1], index: 8, kind: input, shape index: {}]   ;;  %s1806_s9 = inlined_call_operand.hbm [shape: f32[3,128], index: 9, kind: input, shape index: {}]   ;;  %s1807_s10 = inlined_call_operand.hbm [shape: f32[8,128], index: 10, kind: output, shape index: {}]  }
   0x1   :  { %16 = vsyncpa [#allocation6], 0 }
   0x2   :  { %17 = vsyncpa [#allocation9], 0 }
   0x3   :  { %18 = vsyncpa [#allocation12], 0 }
   0x4   :  { %19 = vsyncpa [#allocation15], 0 }
   0x5   :  { %20 = vsyncpa [#allocation18], 0 }
   0x6   :  { %21 = vsyncpa [#allocation4], 0  ;;  %s1471_s13 = smov [#allocation5]   ;;  %s1215_s17 = scalar_lea.hbm %s1798_s1, 4096 }
   0x7   :  { %s37_s14 = sshll.u32 %s1471_s13, 4  ;;  %p1216_p0 = scmp.ne.s32.totalorder %s1798_s1, %s1215_s17  ;;  %s38_s14 = int_to_ptr.vmem [resolvable:$true] %s37_s14 }
   0x8   :  { %p1219_p1 = scmp.lt.u32.totalorder %s1215_s17, %s1798_s1 }
   0xa   :  { %p1221_p2 = pnand %p1219_p1, %p1216_p0 }
   0xc   :  { %1224 = shalt.err (!%p1221_p2)
}
   0xd   :  { %s1225_s22 = scalar_lea.vmem %s38_s14, 4096  ;;  %p1230_p4 = scmp.lt.s32.totalorder %s38_s14, %s38_s14 }
   0xe   :  { %p1226_p3 = scmp.ne.s32.totalorder %s38_s14, %s1225_s22  ;;  %p1231_p5 = scmp.lt.s32.totalorder %s1225_s22, %s1225_s22 }
  0x10   :  { %p1232_p6 = por %p1231_p5, %p1230_p4 }
  0x12   :  { %p1233_p7 = pnand %p1232_p6, %p1226_p3 }
  0x14   :  { %1236 = shalt.err (!%p1233_p7)
}
  0x15   :  { %s1472_s23 = smov 128   ;;  %s1473_s24 = smov 8  }
  0x16   :  { %43 = dma.hbm_to_vmem [thread:$0]  %s1798_s1, 4096, %s38_s14, [#allocation6], %s1472_s23, %s1472_s23, %s1473_s24  }
  0x17   :  { %s1474_s27 = smov [#allocation8]   ;;  %s1475_s29 = smov [#allocation11]  }
  0x18   :  { %s62_s28 = sshll.u32 %s1474_s27, 4  ;;  %s83_s30 = sshll.u32 %s1475_s29, 4  ;;  %s63_s28 = int_to_ptr.vmem [resolvable:$true] %s62_s28  ;;  %s84_s30 = int_to_ptr.vmem [resolvable:$true] %s83_s30 }
  0x19   :  { %s1237_s13 = scalar_lea.hbm %s1800_s3, 64 }
  0x1a   :  { %p1238_p8 = scmp.ne.s32.totalorder %s1800_s3, %s1237_s13  ;;  %p1241_p9 = scmp.lt.u32.totalorder %s1237_s13, %s1800_s3 }
  0x1c   :  { %p1243_p10 = pnand %p1241_p9, %p1238_p8 }
  0x1e   :  { %1246 = shalt.err (!%p1243_p10)
}
  0x1f   :  { %s1247_s1 = scalar_lea.vmem %s63_s28, 64  ;;  %p1252_p12 = scmp.lt.s32.totalorder %s63_s28, %s63_s28 }
  0x20   :  { %p1248_p11 = scmp.ne.s32.totalorder %s63_s28, %s1247_s1  ;;  %p1253_p13 = scmp.lt.s32.totalorder %s1247_s1, %s1247_s1 }
  0x22   :  { %p1254_p0 = por %p1253_p13, %p1252_p12 }
  0x24   :  { %p1255_p1 = pnand %p1254_p0, %p1248_p11 }
  0x26   :  { %1258 = shalt.err (!%p1255_p1)
}
  0x27   :  { %65 = dma.hbm_to_vmem [thread:$0]  %s1800_s3, 64, %s63_s28, [#allocation9]  }
  0x28   :  { %s1259_s22 = scalar_lea.hbm %s1802_s5, 2048 }
  0x29   :  { %p1260_p2 = scmp.ne.s32.totalorder %s1802_s5, %s1259_s22  ;;  %p1263_p3 = scmp.lt.u32.totalorder %s1259_s22, %s1802_s5 }
  0x2b   :  { %p1265_p4 = pnand %p1263_p3, %p1260_p2 }
  0x2d   :  { %1268 = shalt.err (!%p1265_p4)
}
  0x2e   :  { %s1269_s11 = scalar_lea.vmem %s84_s30, 2048  ;;  %p1274_p6 = scmp.lt.s32.totalorder %s84_s30, %s84_s30 }
  0x2f   :  { %p1270_p5 = scmp.ne.s32.totalorder %s84_s30, %s1269_s11  ;;  %p1275_p7 = scmp.lt.s32.totalorder %s1269_s11, %s1269_s11 }
  0x31   :  { %p1276_p8 = por %p1275_p7, %p1274_p6 }
  0x33   :  { %p1277_p9 = pnand %p1276_p8, %p1270_p5 }
  0x35   :  { %1280 = shalt.err (!%p1277_p9)
}
  0x36   :  { %89 = dma.hbm_to_vmem [thread:$0]  %s1802_s5, 2048, %s84_s30, [#allocation12], %s1472_s23, %s1472_s23, %s1473_s24  }
  0x37   :  { %s1476_s12 = smov [#allocation14]   ;;  %s1477_s15 = smov [#allocation2]  }
  0x38   :  { %s105_s13 = sshll.u32 %s1476_s12, 4  ;;  %s28_s16 = sshll.u32 %s1477_s15, 4  ;;  %s106_s13 = int_to_ptr.vmem [resolvable:$true] %s105_s13  ;;  %s29_s16 = int_to_ptr.vmem [resolvable:$true] %s28_s16 }
  0x39   :  { %s1281_s1 = scalar_lea.hbm %s1804_s7, 4096 }
  0x3a   :  { %p1282_p10 = scmp.ne.s32.totalorder %s1804_s7, %s1281_s1  ;;  %p1285_p11 = scmp.lt.u32.totalorder %s1281_s1, %s1804_s7 }
  0x3c   :  { %p1287_p12 = pnand %p1285_p11, %p1282_p10 }
  0x3e   :  { %1290 = shalt.err (!%p1287_p12)
}
  0x3f   :  { %s1291_s5 = scalar_lea.vmem %s106_s13, 4096  ;;  %p1296_p0 = scmp.lt.s32.totalorder %s106_s13, %s106_s13 }
  0x40   :  { %p1292_p13 = scmp.ne.s32.totalorder %s106_s13, %s1291_s5  ;;  %p1297_p1 = scmp.lt.s32.totalorder %s1291_s5, %s1291_s5 }
  0x42   :  { %p1298_p2 = por %p1297_p1, %p1296_p0 }
  0x44   :  { %p1299_p3 = pnand %p1298_p2, %p1292_p13 }
  0x46   :  { %1302 = shalt.err (!%p1299_p3)
}
  0x47   :  { %111 = dma.hbm_to_vmem [thread:$0]  %s1804_s7, 4096, %s106_s13, [#allocation15], %s1472_s23, %s1472_s23, %s1473_s24  }
  0x48   :  { %s1303_s27 = scalar_lea.hbm %s1797_s0, 128 }
  0x49   :  { %p1304_p4 = scmp.ne.s32.totalorder %s1797_s0, %s1303_s27  ;;  %p1307_p5 = scmp.lt.u32.totalorder %s1303_s27, %s1797_s0 }
  0x4b   :  { %p1309_p6 = pnand %p1307_p5, %p1304_p4 }
  0x4d   :  { %1312 = shalt.err (!%p1309_p6)
}
  0x4e   :  { %s1313_s12 = scalar_lea.vmem %s29_s16, 128  ;;  %p1318_p8 = scmp.lt.s32.totalorder %s29_s16, %s29_s16 }
  0x4f   :  { %p1314_p7 = scmp.ne.s32.totalorder %s29_s16, %s1313_s12  ;;  %p1319_p9 = scmp.lt.s32.totalorder %s1313_s12, %s1313_s12 }
  0x51   :  { %p1320_p10 = por %p1319_p9, %p1318_p8 }
  0x53   :  { %p1321_p11 = pnand %p1320_p10, %p1314_p7 }
  0x55   :  { %1324 = shalt.err (!%p1321_p11)
}
  0x56   :  { %31 = dma.hbm_to_vmem [thread:$0]  %s1797_s0, 128, %s29_s16, [#allocation3]  }
  0x57   :  { %s1478_s15 = smov [#allocation7]   ;;  %s1479_s18 = smov [#allocation10]  }
  0x58   :  { %s49_s17 = sshll.u32 %s1478_s15, 4  ;;  %s71_s1 = sshll.u32 %s1479_s18, 4  ;;  %s50_s17 = int_to_ptr.vmem [resolvable:$true] %s49_s17  ;;  %s72_s1 = int_to_ptr.vmem [resolvable:$true] %s71_s1 }
  0x59   :  { %s1325_s20 = scalar_lea.hbm %s1799_s2, 2048 }
  0x5a   :  { %p1326_p12 = scmp.ne.s32.totalorder %s1799_s2, %s1325_s20  ;;  %p1329_p13 = scmp.lt.u32.totalorder %s1325_s20, %s1799_s2 }
  0x5c   :  { %p1331_p0 = pnand %p1329_p13, %p1326_p12 }
  0x5e   :  { %1334 = shalt.err (!%p1331_p0)
}
  0x5f   :  { %s1335_s0 = scalar_lea.vmem %s50_s17, 2048  ;;  %p1340_p2 = scmp.lt.s32.totalorder %s50_s17, %s50_s17 }
  0x60   :  { %p1336_p1 = scmp.ne.s32.totalorder %s50_s17, %s1335_s0  ;;  %p1341_p3 = scmp.lt.s32.totalorder %s1335_s0, %s1335_s0 }
  0x62   :  { %p1342_p4 = por %p1341_p3, %p1340_p2 }
  0x64   :  { %p1343_p5 = pnand %p1342_p4, %p1336_p1 }
  0x66   :  { %1346 = shalt.err (!%p1343_p5)
}
  0x67   :  { %55 = dma.hbm_to_vmem [thread:$0]  %s1799_s2, 2048, %s50_s17, [#allocation6], %s1472_s23, %s1472_s23, %s1473_s24  }
  0x68   :  { %s1347_s29 = scalar_lea.hbm %s1801_s4, 4096 }
  0x69   :  { %p1348_p6 = scmp.ne.s32.totalorder %s1801_s4, %s1347_s29  ;;  %p1351_p7 = scmp.lt.u32.totalorder %s1347_s29, %s1801_s4 }
  0x6b   :  { %p1353_p8 = pnand %p1351_p7, %p1348_p6 }
  0x6d   :  { %1356 = shalt.err (!%p1353_p8)
}
  0x6e   :  { %s1357_s7 = scalar_lea.vmem %s72_s1, 4096  ;;  %p1362_p10 = scmp.lt.s32.totalorder %s72_s1, %s72_s1 }
  0x6f   :  { %p1358_p9 = scmp.ne.s32.totalorder %s72_s1, %s1357_s7  ;;  %p1363_p11 = scmp.lt.s32.totalorder %s1357_s7, %s1357_s7 }
  0x71   :  { %p1364_p12 = por %p1363_p11, %p1362_p10 }
  0x73   :  { %p1365_p13 = pnand %p1364_p12, %p1358_p9 }
  0x75   :  { %1368 = shalt.err (!%p1365_p13)
}
  0x76   :  { %77 = dma.hbm_to_vmem [thread:$0]  %s1801_s4, 4096, %s72_s1, [#allocation9], %s1472_s23, %s1472_s23, %s1473_s24  }
  0x77   :  { %s1480_s15 = smov [#allocation13]   ;;  %s1481_s18 = smov [#allocation16]  }
  0x78   :  { %s96_s17 = sshll.u32 %s1480_s15, 4  ;;  %s117_s14 = sshll.u32 %s1481_s18, 4  ;;  %s97_s17 = int_to_ptr.vmem [resolvable:$true] %s96_s17  ;;  %s118_s14 = int_to_ptr.vmem [resolvable:$true] %s117_s14 }
  0x79   :  { %s1369_s21 = scalar_lea.hbm %s1803_s6, 64 }
  0x7a   :  { %p1370_p0 = scmp.ne.s32.totalorder %s1803_s6, %s1369_s21  ;;  %p1373_p1 = scmp.lt.u32.totalorder %s1369_s21, %s1803_s6 }
  0x7c   :  { %p1375_p2 = pnand %p1373_p1, %p1370_p0 }
  0x7e   :  { %1378 = shalt.err (!%p1375_p2)
}
  0x7f   :  { %s1379_s4 = scalar_lea.vmem %s97_s17, 64  ;;  %p1384_p4 = scmp.lt.s32.totalorder %s97_s17, %s97_s17 }
  0x80   :  { %p1380_p3 = scmp.ne.s32.totalorder %s97_s17, %s1379_s4  ;;  %p1385_p5 = scmp.lt.s32.totalorder %s1379_s4, %s1379_s4 }
  0x82   :  { %p1386_p6 = por %p1385_p5, %p1384_p4 }
  0x84   :  { %p1387_p7 = pnand %p1386_p6, %p1380_p3 }
  0x86   :  { %1390 = shalt.err (!%p1387_p7)
}
  0x87   :  { %99 = dma.hbm_to_vmem [thread:$0]  %s1803_s6, 64, %s97_s17, [#allocation12]  }
  0x88   :  { %s1391_s27 = scalar_lea.hbm %s1805_s8, 2048 }
  0x89   :  { %p1392_p8 = scmp.ne.s32.totalorder %s1805_s8, %s1391_s27  ;;  %p1395_p9 = scmp.lt.u32.totalorder %s1391_s27, %s1805_s8 }
  0x8b   :  { %p1397_p10 = pnand %p1395_p9, %p1392_p8 }
  0x8d   :  { %1400 = shalt.err (!%p1397_p10)
}
  0x8e   :  { %s1401_s12 = scalar_lea.vmem %s118_s14, 2048  ;;  %p1406_p12 = scmp.lt.s32.totalorder %s118_s14, %s118_s14 }
  0x8f   :  { %p1402_p11 = scmp.ne.s32.totalorder %s118_s14, %s1401_s12  ;;  %p1407_p13 = scmp.lt.s32.totalorder %s1401_s12, %s1401_s12 }
  0x91   :  { %p1408_p0 = por %p1407_p13, %p1406_p12 }
  0x93   :  { %p1409_p1 = pnand %p1408_p0, %p1402_p11 }
  0x95   :  { %1412 = shalt.err (!%p1409_p1)
}
  0x96   :  { %123 = dma.hbm_to_vmem [thread:$0]  %s1805_s8, 2048, %s118_s14, [#allocation15], %s1472_s23, %s1472_s23, %s1473_s24  }
  0x97   :  { %s1482_s2 = smov [#allocation17]   ;;  %s1413_s18 = scalar_lea.hbm %s1806_s9, 64 }
  0x98   :  { %s130_s13 = sshll.u32 %s1482_s2, 4  ;;  %p1414_p2 = scmp.ne.s32.totalorder %s1806_s9, %s1413_s18  ;;  %s131_s13 = int_to_ptr.vmem [resolvable:$true] %s130_s13 }
  0x99   :  { %p1417_p3 = scmp.lt.u32.totalorder %s1413_s18, %s1806_s9 }
  0x9b   :  { %p1419_p4 = pnand %p1417_p3, %p1414_p2 }
  0x9d   :  { %1422 = shalt.err (!%p1419_p4)
}
  0x9e   :  { %s1423_s30 = scalar_lea.vmem %s131_s13, 64  ;;  %p1428_p6 = scmp.lt.s32.totalorder %s131_s13, %s131_s13 }
  0x9f   :  { %p1424_p5 = scmp.ne.s32.totalorder %s131_s13, %s1423_s30  ;;  %p1429_p7 = scmp.lt.s32.totalorder %s1423_s30, %s1423_s30 }
  0xa1   :  { %p1430_p8 = por %p1429_p7, %p1428_p6 }
  0xa3   :  { %p1431_p9 = pnand %p1430_p8, %p1424_p5 }
  0xa5   :  { %1434 = shalt.err (!%p1431_p9)
}
  0xa6   :  { %133 = dma.hbm_to_vmem [thread:$0]  %s1806_s9, 64, %s131_s13, [#allocation18]  }
  0xa7   :  { %1457 = dma.done.wait [#allocation3], 128  }
  0xa8   :  { %1458 = vsyncadd [#allocation3], 4294967168 }
  0xa9   :  { %1459 = dma.done.wait [#allocation6], 6144  }
  0xaa   :  { %1460 = vsyncadd [#allocation6], 4294961152 }
  0xab   :  { %1461 = dma.done.wait [#allocation9], 4160  }
  0xac   :  { %1462 = vsyncadd [#allocation9], 4294963136 }
  0xad   :  { %1463 = dma.done.wait [#allocation12], 2112  }
  0xae   :  { %1464 = vsyncadd [#allocation12], 4294965184 }
  0xaf   :  { %1465 = dma.done.wait [#allocation15], 6144  }
  0xb0   :  { %1466 = vsyncadd [#allocation15], 4294961152 }
  0xb1   :  { %1467 = dma.done.wait [#allocation18], 64  }
  0xb2   :  { %1468 = vsyncadd [#allocation18], 4294967232  ;;  %v1483_v0 = vmov 0   ;;  %v172_v1 = vld [vmem:[#allocation7 + $0x10] sm:$0xff]  ;;  %v170_v2 = vld [vmem:[#allocation7] sm:$0xff]  ;;  %v1484_v9 = vmov 0.0|0.0   ;;  %v266_v51 = vlaneseq }
  0xb3   :  { %1214 = vset.pattern.permute.xlu1 %v1483_v0  ;;  %1213 = vset.pattern.permute.xlu0 %v1483_v0  ;;  %v173_v3 = vld [vmem:[#allocation7 + $0x18] sm:$0xff]  ;;  %v171_v4 = vld [vmem:[#allocation7 + $0x8] sm:$0xff]  ;;  %v174_v6 = vld [vmem:[#allocation7 + $0x20] sm:$0xff]  ;;  %vm1485_vm0 = vmmov 0   ;;  %v1486_v26 = vmov 0.0   ;;  %s1487_s9 = smov [#allocation19]  }
  0xb4   :  { %198 = vperm.xlu1 %1214, %v172_v1   ;;  %188 = vperm.xlu0 %1213, %v170_v2   ;;  %v175_v5 = vld [vmem:[#allocation7 + $0x28] sm:$0xff]  ;;  %v177_v7 = vld [vmem:[#allocation7 + $0x38] sm:$0xff]  ;;  %v176_v8 = vld [vmem:[#allocation7 + $0x30] sm:$0xff]  ;;  %v267_v52 = vshrl.u32 %v266_v51, 7  ;;  %s954_s24 = sshll.u32 %s1487_s9, 4  ;;  %s955_s24 = int_to_ptr.vmem [resolvable:$true] %s954_s24 }
  0xb5   :  { %1124 = vmatprep.subr.bf16.mxu0 %v1484_v9  ;;  %1148 = vmatprep.subr.bf16.mxu1 %v1484_v9  ;;  %v179_v10 = vld [vmem:[#allocation7 + $0x48] sm:$0xff]  ;;  %v178_v11 = vld [vmem:[#allocation7 + $0x40] sm:$0xff]  ;;  %v181_v12 = vld [vmem:[#allocation7 + $0x58] sm:$0xff]  ;;  %s1435_s14 = scalar_lea.vmem %s955_s24, 128  ;;  %p1440_p11 = scmp.lt.s32.totalorder %s955_s24, %s955_s24 }
  0xb6   :  { %v180_v13 = vld [vmem:[#allocation7 + $0x50] sm:$0xff]  ;;  %v183_v14 = vld [vmem:[#allocation7 + $0x68] sm:$0xff]  ;;  %v182_v15 = vld [vmem:[#allocation7 + $0x60] sm:$0xff]  ;;  %1051 = vmatprep.mubr.msk.f32.mxu0 %vm1485_vm0, %v1486_v26  ;;  %1086 = vmatprep.mubr.msk.f32.mxu1 %vm1485_vm0, %v1486_v26  ;;  %v1687_v53 = vsub.s32 0, %v267_v52  ;;  %p1436_p10 = scmp.ne.s32.totalorder %s955_s24, %s1435_s14  ;;  %p1441_p12 = scmp.lt.s32.totalorder %s1435_s14, %s1435_s14 }
  0xb7   :  { %v185_v16 = vld [vmem:[#allocation7 + $0x78] sm:$0xff]  ;;  %v184_v17 = vld [vmem:[#allocation7 + $0x70] sm:$0xff]  ;;  %v431_v19 = vld [vmem:[#allocation11] sm:$0xff] }
  0xb8   :  { %203 = vperm.xlu1 %1214, %v173_v3   ;;  %193 = vperm.xlu0 %1213, %v171_v4   ;;  %v432_v18 = vld [vmem:[#allocation11 + $0x8] sm:$0xff]  ;;  %v434_v20 = vld [vmem:[#allocation11 + $0x18] sm:$0xff]  ;;  %v433_v21 = vld [vmem:[#allocation11 + $0x10] sm:$0xff]  ;;  %p1442_p13 = por %p1441_p12, %p1440_p11 }
  0xb9   :  { %v436_v22 = vld [vmem:[#allocation11 + $0x28] sm:$0xff]  ;;  %v435_v23 = vld [vmem:[#allocation11 + $0x20] sm:$0xff]  ;;  %v438_v24 = vld [vmem:[#allocation11 + $0x38] sm:$0xff] }
  0xba   :  { %v437_v25 = vld [vmem:[#allocation11 + $0x30] sm:$0xff]  ;;  %v440_v27 = vld [vmem:[#allocation11 + $0x48] sm:$0xff]  ;;  %v439_v28 = vld [vmem:[#allocation11 + $0x40] sm:$0xff]  ;;  %p1443_p0 = pnand %p1442_p13, %p1436_p10 }
  0xbb   :  { %v442_v29 = vld [vmem:[#allocation11 + $0x58] sm:$0xff]  ;;  %v441_v30 = vld [vmem:[#allocation11 + $0x50] sm:$0xff]  ;;  %v444_v31 = vld [vmem:[#allocation11 + $0x68] sm:$0xff] }
  0xbc   :  { %213 = vperm.xlu1 %1214, %v175_v5   ;;  %208 = vperm.xlu0 %1213, %v174_v6   ;;  %v443_v32 = vld [vmem:[#allocation11 + $0x60] sm:$0xff]  ;;  %v446_v33 = vld [vmem:[#allocation11 + $0x78] sm:$0xff]  ;;  %v445_v34 = vld [vmem:[#allocation11 + $0x70] sm:$0xff] }
  0xbd   :  { %v693_v35 = vld [vmem:[#allocation16 + $0x8] sm:$0xff]  ;;  %v692_v36 = vld [vmem:[#allocation16] sm:$0xff]  ;;  %v695_v37 = vld [vmem:[#allocation16 + $0x18] sm:$0xff] }
  0xbe   :  { %v694_v38 = vld [vmem:[#allocation16 + $0x10] sm:$0xff]  ;;  %v697_v39 = vld [vmem:[#allocation16 + $0x28] sm:$0xff]  ;;  %v696_v40 = vld [vmem:[#allocation16 + $0x20] sm:$0xff] }
  0xbf   :  { %v699_v41 = vld [vmem:[#allocation16 + $0x38] sm:$0xff]  ;;  %v698_v42 = vld [vmem:[#allocation16 + $0x30] sm:$0xff]  ;;  %v701_v43 = vld [vmem:[#allocation16 + $0x48] sm:$0xff] }
  0xc0   :  { %223 = vperm.xlu1 %1214, %v177_v7   ;;  %218 = vperm.xlu0 %1213, %v176_v8   ;;  %v700_v44 = vld [vmem:[#allocation16 + $0x40] sm:$0xff]  ;;  %v703_v45 = vld [vmem:[#allocation16 + $0x58] sm:$0xff]  ;;  %v702_v46 = vld [vmem:[#allocation16 + $0x50] sm:$0xff] }
  0xc1   :  { %v705_v47 = vld [vmem:[#allocation16 + $0x68] sm:$0xff]  ;;  %v704_v48 = vld [vmem:[#allocation16 + $0x60] sm:$0xff]  ;;  %v707_v49 = vld [vmem:[#allocation16 + $0x78] sm:$0xff] }
  0xc2   :  { %v706_v50 = vld [vmem:[#allocation16 + $0x70] sm:$0xff]  ;;  %v1689_v54 = vld [vmem:[#allocation8] sm:$0x1]  ;;  %v305_v61 = vld [vmem:[#allocation5 + $0x90] sm:$0xff] }
  0xc3   :  { %v1693_v55 = vrot.slane %v1689_v54, %v1687_v53  ;;  %v303_v60 = vld [vmem:[#allocation5 + $0x80] sm:$0xff]  ;;  %v306_v62 = vld [vmem:[#allocation5 + $0x98] sm:$0xff]  ;;  %v304_v0 = vld [vmem:[#allocation5 + $0x88] sm:$0xff] }
  0xc4   :  { %233 = vperm.xlu1 %1214, %v179_v10   ;;  %228 = vperm.xlu0 %1213, %v178_v11   ;;  %v286_v6 = vld [vmem:[#allocation5] sm:$0xff]  ;;  %v287_v7 = vld [vmem:[#allocation5 + $0x8] sm:$0xff]  ;;  %v288_v8 = vld [vmem:[#allocation5 + $0x10] sm:$0xff] }
  0xc5   :  { %v295_v51 = vld [vmem:[#allocation5 + $0x48] sm:$0xff] }
  0xc8   :  { %243 = vperm.xlu1 %1214, %v181_v12   ;;  %238 = vperm.xlu0 %1213, %v180_v13   ;;  %v289_v12 = vld [vmem:[#allocation5 + $0x18] sm:$0xff]  ;;  %v308_v13 = vld [vmem:[#allocation5 + $0xa8] sm:$0xff] }
  0xcc   :  { %253 = vperm.xlu1 %1214, %v183_v14   ;;  %248 = vperm.xlu0 %1213, %v182_v15   ;;  %v307_v15 = vld [vmem:[#allocation5 + $0xa0] sm:$0xff] }
  0xd0   :  { %263 = vperm.xlu1 %1214, %v185_v16   ;;  %258 = vperm.xlu0 %1213, %v184_v17  }
  0xd4   :  { %454 = vperm.xlu1 %1214, %v432_v18   ;;  %449 = vperm.xlu0 %1213, %v431_v19  }
  0xd8   :  { %464 = vperm.xlu1 %1214, %v434_v20   ;;  %459 = vperm.xlu0 %1213, %v433_v21  }
  0xdc   :  { %474 = vperm.xlu1 %1214, %v436_v22   ;;  %469 = vperm.xlu0 %1213, %v435_v23   ;;  %v291_v23 = vld [vmem:[#allocation5 + $0x28] sm:$0xff] }
  0xe0   :  { %484 = vperm.xlu1 %1214, %v438_v24   ;;  %479 = vperm.xlu0 %1213, %v437_v25   ;;  %v290_v25 = vld [vmem:[#allocation5 + $0x20] sm:$0xff] }
  0xe4   :  { %494 = vperm.xlu1 %1214, %v440_v27   ;;  %489 = vperm.xlu0 %1213, %v439_v28  }
  0xe8   :  { %504 = vperm.xlu1 %1214, %v442_v29   ;;  %499 = vperm.xlu0 %1213, %v441_v30   ;;  %v310_v29 = vld [vmem:[#allocation5 + $0xb8] sm:$0xff] }
  0xec   :  { %514 = vperm.xlu1 %1214, %v444_v31   ;;  %509 = vperm.xlu0 %1213, %v443_v32   ;;  %v309_v31 = vld [vmem:[#allocation5 + $0xb0] sm:$0xff] }
  0xf0   :  { %524 = vperm.xlu1 %1214, %v446_v33   ;;  %519 = vperm.xlu0 %1213, %v445_v34  }
  0xf4   :  { %715 = vperm.xlu1 %1214, %v693_v35   ;;  %710 = vperm.xlu0 %1213, %v692_v36  }
  0xf8   :  { %725 = vperm.xlu1 %1214, %v695_v37   ;;  %720 = vperm.xlu0 %1213, %v694_v38   ;;  %v293_v37 = vld [vmem:[#allocation5 + $0x38] sm:$0xff] }
  0xfc   :  { %735 = vperm.xlu1 %1214, %v697_v39   ;;  %730 = vperm.xlu0 %1213, %v696_v40  }
 0x100   :  { %745 = vperm.xlu1 %1214, %v699_v41   ;;  %740 = vperm.xlu0 %1213, %v698_v42   ;;  %v292_v41 = vld [vmem:[#allocation5 + $0x30] sm:$0xff]  ;;  %v312_v42 = vld [vmem:[#allocation5 + $0xc8] sm:$0xff] }
 0x104   :  { %755 = vperm.xlu1 %1214, %v701_v43   ;;  %750 = vperm.xlu0 %1213, %v700_v44   ;;  %v311_v44 = vld [vmem:[#allocation5 + $0xc0] sm:$0xff] }
 0x108   :  { %765 = vperm.xlu1 %1214, %v703_v45   ;;  %760 = vperm.xlu0 %1213, %v702_v46  }
 0x10c   :  { %775 = vperm.xlu1 %1214, %v705_v47   ;;  %770 = vperm.xlu0 %1213, %v704_v48  }
 0x110   :  { %785 = vperm.xlu1 %1214, %v707_v49   ;;  %780 = vperm.xlu0 %1213, %v706_v50  }
 0x133   :  { %v199_v56 = vpop.permute.xlu1 %198  ;;  %v189_v57 = vpop.permute.xlu0 %188 }
 0x134   :  { %v270_v58 = vmul.f32 %v1693_v55, %v189_v57  ;;  %v272_v59 = vmul.f32 %v1693_v55, %v199_v56  ;;  %v294_v56 = vld [vmem:[#allocation5 + $0x40] sm:$0xff] }
 0x136   :  { %v319_v2 = vmul.f32 %v303_v60, %v270_v58  ;;  %v321_v5 = vmul.f32 %v305_v61, %v272_v59  ;;  %v314_v58 = vld [vmem:[#allocation5 + $0xd8] sm:$0xff]  ;;  %v313_v60 = vld [vmem:[#allocation5 + $0xd0] sm:$0xff] }
 0x137   :  { %v204_v63 = vpop.permute.xlu1 %203  ;;  %v194_v1 = vpop.permute.xlu0 %193 }
 0x138   :  { %v273_v3 = vmul.f32 %v1693_v55, %v204_v63  ;;  %v271_v4 = vmul.f32 %v1693_v55, %v194_v1  ;;  %v335_v19 = vadd.f32 %v319_v2, %v286_v6  ;;  %v337_v21 = vadd.f32 %v321_v5, %v288_v8  ;;  %v297_v2 = vld [vmem:[#allocation5 + $0x58] sm:$0xff]  ;;  %v296_v6 = vld [vmem:[#allocation5 + $0x50] sm:$0xff] }
 0x13a   :  { %v322_v10 = vmul.f32 %v306_v62, %v273_v3  ;;  %v320_v11 = vmul.f32 %v304_v0, %v271_v4 }
 0x13b   :  { %v214_v14 = vpop.permute.xlu1 %213  ;;  %v209_v16 = vpop.permute.xlu0 %208 }
 0x13c   :  { %v275_v17 = vmul.f32 %v1693_v55, %v214_v14  ;;  %v274_v18 = vmul.f32 %v1693_v55, %v209_v16  ;;  %v336_v20 = vadd.f32 %v320_v11, %v287_v7  ;;  %v338_v22 = vadd.f32 %v322_v10, %v289_v12  ;;  %v316_v7 = vld [vmem:[#allocation5 + $0xe8] sm:$0xff]  ;;  %v315_v10 = vld [vmem:[#allocation5 + $0xe0] sm:$0xff] }
 0x13e   :  { %v324_v24 = vmul.f32 %v308_v13, %v275_v17  ;;  %v323_v27 = vmul.f32 %v307_v15, %v274_v18  ;;  %v1125_v28 = vpack.c.bf16 %v336_v20, %v335_v19  ;;  %v1128_v40 = vpack.c.bf16 %v338_v22, %v337_v21  ;;  %v1713_v15 = vld [vmem:[#allocation13] sm:$0x1]  ;;  %v299_v18 = vld [vmem:[#allocation5 + $0x68] sm:$0xff]  ;;  %v318_v22 = vld [vmem:[#allocation5 + $0xf8] sm:$0xff] }
 0x13f   :  { %v224_v30 = vpop.permute.xlu1 %223  ;;  %v219_v32 = vpop.permute.xlu0 %218  ;;  %v298_v20 = vld [vmem:[#allocation5 + $0x60] sm:$0xff] }
 0x140   :  { %v277_v33 = vmul.f32 %v1693_v55, %v224_v30  ;;  %v276_v34 = vmul.f32 %v1693_v55, %v219_v32  ;;  %1126 = vmatpush3.bf16.msra.mxu0 %v1125_v28  ;;  %v340_v35 = vadd.f32 %v324_v24, %v291_v23  ;;  %v339_v36 = vadd.f32 %v323_v27, %v290_v25  ;;  %v317_v24 = vld [vmem:[#allocation5 + $0xf0] sm:$0xff]  ;;  %v301_v32 = vld [vmem:[#allocation5 + $0x78] sm:$0xff] }
 0x141   :  { %1127 = vmatprep.subr.bf16.mxu0 %v1484_v9 }
 0x142   :  { %v326_v38 = vmul.f32 %v310_v29, %v277_v33  ;;  %v325_v39 = vmul.f32 %v309_v31, %v276_v34  ;;  %v1131_v48 = vpack.c.bf16 %v340_v35, %v339_v36  ;;  %v1719_v29 = vrot.slane %v1713_v15, %v1687_v53  ;;  %v300_v36 = vld [vmem:[#allocation5 + $0x70] sm:$0xff] }
 0x143   :  { %v234_v43 = vpop.permute.xlu1 %233  ;;  %v229_v45 = vpop.permute.xlu0 %228 }
 0x144   :  { %v279_v46 = vmul.f32 %v1693_v55, %v234_v43  ;;  %v278_v47 = vmul.f32 %v1693_v55, %v229_v45  ;;  %1129 = vmatpush3.bf16.msra.mxu0 %v1128_v40  ;;  %v342_v49 = vadd.f32 %v326_v38, %v293_v37  ;;  %v341_v50 = vadd.f32 %v325_v39, %v292_v41  ;;  %v565_v37 = vld [vmem:[#allocation10 + $0x88] sm:$0xff]  ;;  %v564_v39 = vld [vmem:[#allocation10 + $0x80] sm:$0xff] }
 0x145   :  { %1130 = vmatprep.subr.bf16.mxu0 %v1484_v9  ;;  %v547_v43 = vld [vmem:[#allocation10] sm:$0xff] }
 0x146   :  { %v328_v52 = vmul.f32 %v312_v42, %v279_v46  ;;  %v327_v57 = vmul.f32 %v311_v44, %v278_v47  ;;  %v1134_v5 = vpack.c.bf16 %v342_v49, %v341_v50  ;;  %v548_v44 = vld [vmem:[#allocation10 + $0x8] sm:$0xff]  ;;  %v567_v49 = vld [vmem:[#allocation10 + $0x98] sm:$0xff] }
 0x147   :  { %v244_v59 = vpop.permute.xlu1 %243  ;;  %v239_v61 = vpop.permute.xlu0 %238 }
 0x148   :  { %v281_v62 = vmul.f32 %v1693_v55, %v244_v59  ;;  %v280_v63 = vmul.f32 %v1693_v55, %v239_v61  ;;  %1132 = vmatpush3.bf16.msra.mxu0 %v1131_v48  ;;  %v344_v0 = vadd.f32 %v328_v52, %v295_v51  ;;  %v343_v1 = vadd.f32 %v327_v57, %v294_v56  ;;  %v566_v51 = vld [vmem:[#allocation10 + $0x90] sm:$0xff] }
 0x149   :  { %1133 = vmatprep.subr.bf16.mxu0 %v1484_v9  ;;  %v549_v61 = vld [vmem:[#allocation10 + $0x10] sm:$0xff] }
 0x14a   :  { %v330_v3 = vmul.f32 %v314_v58, %v281_v62  ;;  %v329_v4 = vmul.f32 %v313_v60, %v280_v63  ;;  %v1137_v14 = vpack.c.bf16 %v344_v0, %v343_v1  ;;  %v550_v60 = vld [vmem:[#allocation10 + $0x18] sm:$0xff] }
 0x14b   :  { %v254_v8 = vpop.permute.xlu1 %253  ;;  %v249_v11 = vpop.permute.xlu0 %248 }
 0x14c   :  { %v283_v12 = vmul.f32 %v1693_v55, %v254_v8  ;;  %v282_v13 = vmul.f32 %v1693_v55, %v249_v11  ;;  %1135 = vmatpush3.bf16.msra.mxu0 %v1134_v5  ;;  %v346_v16 = vadd.f32 %v330_v3, %v297_v2  ;;  %v345_v17 = vadd.f32 %v329_v4, %v296_v6  ;;  %v569_v2 = vld [vmem:[#allocation10 + $0xa8] sm:$0xff]  ;;  %v568_v4 = vld [vmem:[#allocation10 + $0xa0] sm:$0xff]  ;;  %v164_v11 = vld [vmem:[#allocation2] sm:$0xff] }
 0x14d   :  { %1136 = vmatprep.subr.bf16.mxu0 %v1484_v9 }
 0x14e   :  { %v332_v19 = vmul.f32 %v316_v7, %v283_v12  ;;  %v331_v21 = vmul.f32 %v315_v10, %v282_v13  ;;  %v1140_v35 = vpack.c.bf16 %v346_v16, %v345_v17  ;;  %v552_v12 = vld [vmem:[#allocation10 + $0x28] sm:$0xff]  ;;  %v551_v13 = vld [vmem:[#allocation10 + $0x20] sm:$0xff] }
 0x14f   :  { %v264_v23 = vpop.permute.xlu1 %263  ;;  %v259_v25 = vpop.permute.xlu0 %258 }
 0x150   :  { %v285_v27 = vmul.f32 %v1693_v55, %v264_v23  ;;  %v284_v28 = vmul.f32 %v1693_v55, %v259_v25  ;;  %1138 = vmatpush3.bf16.msra.mxu0 %v1137_v14  ;;  %v348_v30 = vadd.f32 %v332_v19, %v299_v18  ;;  %v347_v31 = vadd.f32 %v331_v21, %v298_v20  ;;  %v571_v18 = vld [vmem:[#allocation10 + $0xb8] sm:$0xff]  ;;  %v570_v20 = vld [vmem:[#allocation10 + $0xb0] sm:$0xff] }
 0x151   :  { %1139 = vmatprep.subr.bf16.mxu0 %v1484_v9 }
 0x152   :  { %v334_v33 = vmul.f32 %v318_v22, %v285_v27  ;;  %v333_v34 = vmul.f32 %v317_v24, %v284_v28  ;;  %v1143_v42 = vpack.c.bf16 %v348_v30, %v347_v31  ;;  %v554_v27 = vld [vmem:[#allocation10 + $0x38] sm:$0xff]  ;;  %v553_v28 = vld [vmem:[#allocation10 + $0x30] sm:$0xff] }
 0x153   :  { %v455_v38 = vpop.permute.xlu1 %454  ;;  %v450_v40 = vpop.permute.xlu0 %449 }
 0x154   :  { %v532_v55 = vmul.f32 %v1719_v29, %v455_v38  ;;  %v531_v41 = vmul.f32 %v1719_v29, %v450_v40  ;;  %1141 = vmatpush3.bf16.msra.mxu0 %v1140_v35  ;;  %v350_v45 = vadd.f32 %v334_v33, %v301_v32  ;;  %v349_v46 = vadd.f32 %v333_v34, %v300_v36  ;;  %v573_v33 = vld [vmem:[#allocation10 + $0xc8] sm:$0xff]  ;;  %v572_v35 = vld [vmem:[#allocation10 + $0xc0] sm:$0xff] }
 0x155   :  { %1142 = vmatprep.subr.bf16.mxu0 %v1484_v9 }
 0x156   :  { %v581_v47 = vmul.f32 %v565_v37, %v532_v55  ;;  %v580_v48 = vmul.f32 %v564_v39, %v531_v41  ;;  %v1146_v0 = vpack.c.bf16 %v350_v45, %v349_v46  ;;  %v556_v55 = vld [vmem:[#allocation10 + $0x48] sm:$0xff]  ;;  %v574_v46 = vld [vmem:[#allocation10 + $0xd0] sm:$0xff] }
 0x157   :  { %v465_v50 = vpop.permute.xlu1 %464  ;;  %v460_v52 = vpop.permute.xlu0 %459 }
 0x158   :  { %v534_v56 = vmul.f32 %v1719_v29, %v465_v50  ;;  %v533_v57 = vmul.f32 %v1719_v29, %v460_v52  ;;  %1144 = vmatpush3.bf16.msra.mxu0 %v1143_v42  ;;  %v596_v58 = vadd.f32 %v580_v48, %v547_v43  ;;  %v597_v59 = vadd.f32 %v581_v47, %v548_v44  ;;  %v575_v44 = vld [vmem:[#allocation10 + $0xd8] sm:$0xff] }
 0x159   :  { %1145 = vmatprep.subr.bf16.mxu0 %v1484_v9  ;;  %v558_v52 = vld [vmem:[#allocation10 + $0x58] sm:$0xff] }
 0x15a   :  { %v583_v62 = vmul.f32 %v567_v49, %v534_v56  ;;  %v582_v63 = vmul.f32 %v566_v51, %v533_v57  ;;  %v1149_v1 = vpack.c.bf16 %v597_v59, %v596_v58  ;;  %v557_v56 = vld [vmem:[#allocation10 + $0x50] sm:$0xff] }
 0x15b   :  { %v475_v3 = vpop.permute.xlu1 %474  ;;  %v470_v5 = vpop.permute.xlu0 %469 }
 0x15c   :  { %v599_v6 = vadd.f32 %v583_v62, %v550_v60  ;;  %v598_v7 = vadd.f32 %v582_v63, %v549_v61  ;;  %v536_v8 = vmul.f32 %v1719_v29, %v475_v3  ;;  %v535_v10 = vmul.f32 %v1719_v29, %v470_v5  ;;  %1147 = vmatpush3.bf16.msra.mxu0 %v1146_v0  ;;  %v577_v60 = vld [vmem:[#allocation10 + $0xe8] sm:$0xff]  ;;  %v576_v62 = vld [vmem:[#allocation10 + $0xe0] sm:$0xff] }
 0x15d   :  { %1150 = vmatpush3.bf16.msra.mxu1 %v1149_v1  ;;  %1172 = vmatprep.subr.bf16.mxu0 %v1484_v9  ;;  %v560_v5 = vld [vmem:[#allocation10 + $0x68] sm:$0xff] }
 0x15e   :  { %v585_v14 = vmul.f32 %v569_v2, %v536_v8  ;;  %v584_v16 = vmul.f32 %v568_v4, %v535_v10  ;;  %1151 = vmatprep.subr.bf16.mxu1 %v1484_v9  ;;  %v1152_v17 = vpack.c.bf16 %v599_v6, %v598_v7  ;;  %v1745_v4 = vld [vmem:[#allocation17] sm:$0x1] }
 0x15f   :  { %v485_v19 = vpop.permute.xlu1 %484  ;;  %v480_v21 = vpop.permute.xlu0 %479  ;;  %1052 = vmatmul.mubr.f32.vlgmr.msra.gmra.mrb[0].mxu0 %v164_v11  ;;  %v559_v6 = vld [vmem:[#allocation10 + $0x60] sm:$0xff]  ;;  %v579_v11 = vld [vmem:[#allocation10 + $0xf8] sm:$0xff] }
 0x160   :  { %v601_v22 = vadd.f32 %v585_v14, %v552_v12  ;;  %v600_v23 = vadd.f32 %v584_v16, %v551_v13  ;;  %v538_v24 = vmul.f32 %v1719_v29, %v485_v19  ;;  %v537_v25 = vmul.f32 %v1719_v29, %v480_v21  ;;  %1121 = vmatprep.mubr.msk.f32.mxu0 %vm1485_vm0, %v1486_v26  ;;  %v555_v26 = vld [vmem:[#allocation10 + $0x40] sm:$0xff]  ;;  %v578_v13 = vld [vmem:[#allocation10 + $0xf0] sm:$0xff]  ;;  %v562_v21 = vld [vmem:[#allocation10 + $0x78] sm:$0xff] }
 0x161   :  { %1153 = vmatpush3.bf16.msra.mxu1 %v1152_v17  ;;  %v1750_v16 = vrot.slane %v1745_v4, %v1687_v53 }
 0x162   :  { %v587_v30 = vmul.f32 %v571_v18, %v538_v24  ;;  %v586_v31 = vmul.f32 %v570_v20, %v537_v25  ;;  %1154 = vmatprep.subr.bf16.mxu1 %v1484_v9  ;;  %v1155_v32 = vpack.c.bf16 %v601_v22, %v600_v23  ;;  %v561_v22 = vld [vmem:[#allocation10 + $0x70] sm:$0xff] }
 0x163   :  { %v495_v34 = vpop.permute.xlu1 %494  ;;  %v490_v36 = vpop.permute.xlu0 %489 }
 0x164   :  { %v603_v37 = vadd.f32 %v587_v30, %v554_v27  ;;  %v602_v38 = vadd.f32 %v586_v31, %v553_v28  ;;  %v540_v39 = vmul.f32 %v1719_v29, %v495_v34  ;;  %v539_v40 = vmul.f32 %v1719_v29, %v490_v36  ;;  %v826_v27 = vld [vmem:[#allocation14 + $0x88] sm:$0xff]  ;;  %v825_v30 = vld [vmem:[#allocation14 + $0x80] sm:$0xff] }
 0x165   :  { %1156 = vmatpush3.bf16.msra.mxu1 %v1155_v32  ;;  %v809_v36 = vld [vmem:[#allocation14 + $0x8] sm:$0xff] }
 0x166   :  { %v589_v41 = vmul.f32 %v573_v33, %v540_v39  ;;  %v588_v42 = vmul.f32 %v572_v35, %v539_v40  ;;  %1157 = vmatprep.subr.bf16.mxu1 %v1484_v9  ;;  %v1158_v43 = vpack.c.bf16 %v603_v37, %v602_v38  ;;  %v828_v40 = vld [vmem:[#allocation14 + $0x98] sm:$0xff] }
 0x167   :  { %v505_v45 = vpop.permute.xlu1 %504  ;;  %v500_v47 = vpop.permute.xlu0 %499 }
 0x168   :  { %v605_v48 = vadd.f32 %v589_v41, %v556_v55  ;;  %v604_v49 = vadd.f32 %v588_v42, %v555_v26  ;;  %v542_v50 = vmul.f32 %v1719_v29, %v505_v45  ;;  %v541_v51 = vmul.f32 %v1719_v29, %v500_v47  ;;  %v827_v26 = vld [vmem:[#allocation14 + $0x90] sm:$0xff] }
 0x169   :  { %1159 = vmatpush3.bf16.msra.mxu1 %v1158_v43  ;;  %v810_v47 = vld [vmem:[#allocation14 + $0x10] sm:$0xff] }
 0x16a   :  { %v591_v57 = vmul.f32 %v575_v44, %v542_v50  ;;  %v590_v58 = vmul.f32 %v574_v46, %v541_v51  ;;  %1160 = vmatprep.subr.bf16.mxu1 %v1484_v9  ;;  %v1161_v59 = vpack.c.bf16 %v605_v48, %v604_v49  ;;  %v811_v46 = vld [vmem:[#allocation14 + $0x18] sm:$0xff]  ;;  %v830_v51 = vld [vmem:[#allocation14 + $0xa8] sm:$0xff] }
 0x16b   :  { %v515_v61 = vpop.permute.xlu1 %514  ;;  %v510_v63 = vpop.permute.xlu0 %509 }
 0x16c   :  { %v607_v0 = vadd.f32 %v591_v57, %v558_v52  ;;  %v606_v1 = vadd.f32 %v590_v58, %v557_v56  ;;  %v544_v2 = vmul.f32 %v1719_v29, %v515_v61  ;;  %v543_v3 = vmul.f32 %v1719_v29, %v510_v63  ;;  %v829_v56 = vld [vmem:[#allocation14 + $0xa0] sm:$0xff] }
 0x16d   :  { %1162 = vmatpush3.bf16.msra.mxu1 %v1161_v59  ;;  %v812_v63 = vld [vmem:[#allocation14 + $0x20] sm:$0xff] }
 0x16e   :  { %v593_v7 = vmul.f32 %v577_v60, %v544_v2  ;;  %v592_v8 = vmul.f32 %v576_v62, %v543_v3  ;;  %1163 = vmatprep.subr.bf16.mxu1 %v1484_v9  ;;  %v1164_v10 = vpack.c.bf16 %v607_v0, %v606_v1  ;;  %v813_v62 = vld [vmem:[#allocation14 + $0x28] sm:$0xff]  ;;  %v832_v3 = vld [vmem:[#allocation14 + $0xb8] sm:$0xff] }
 0x16f   :  { %v525_v12 = vpop.permute.xlu1 %524  ;;  %v520_v14 = vpop.permute.xlu0 %519 }
 0x170   :  { %v609_v17 = vadd.f32 %v593_v7, %v560_v5  ;;  %v608_v18 = vadd.f32 %v592_v8, %v559_v6  ;;  %v546_v19 = vmul.f32 %v1719_v29, %v525_v12  ;;  %v545_v20 = vmul.f32 %v1719_v29, %v520_v14  ;;  %v808_v29 = vld [vmem:[#allocation14] sm:$0xff]  ;;  %v831_v6 = vld [vmem:[#allocation14 + $0xb0] sm:$0xff] }
 0x171   :  { %1165 = vmatpush3.bf16.msra.mxu1 %v1164_v10  ;;  %v814_v14 = vld [vmem:[#allocation14 + $0x30] sm:$0xff] }
 0x172   :  { %v595_v23 = vmul.f32 %v579_v11, %v546_v19  ;;  %v594_v24 = vmul.f32 %v578_v13, %v545_v20  ;;  %1166 = vmatprep.subr.bf16.mxu1 %v1484_v9  ;;  %v1167_v25 = vpack.c.bf16 %v609_v17, %v608_v18  ;;  %v815_v13 = vld [vmem:[#allocation14 + $0x38] sm:$0xff]  ;;  %v834_v20 = vld [vmem:[#allocation14 + $0xc8] sm:$0xff] }
 0x173   :  { %v716_v28 = vpop.permute.xlu1 %715  ;;  %v711_v31 = vpop.permute.xlu0 %710 }
 0x174   :  { %v611_v32 = vadd.f32 %v595_v23, %v562_v21  ;;  %v610_v33 = vadd.f32 %v594_v24, %v561_v22  ;;  %v793_v34 = vmul.f32 %v1750_v16, %v716_v28  ;;  %v792_v35 = vmul.f32 %v1750_v16, %v711_v31  ;;  %v833_v22 = vld [vmem:[#allocation14 + $0xc0] sm:$0xff] }
 0x175   :  { %1168 = vmatpush3.bf16.msra.mxu1 %v1167_v25  ;;  %v816_v31 = vld [vmem:[#allocation14 + $0x40] sm:$0xff] }
 0x176   :  { %v842_v37 = vmul.f32 %v826_v27, %v793_v34  ;;  %v841_v38 = vmul.f32 %v825_v30, %v792_v35  ;;  %1169 = vmatprep.subr.bf16.mxu1 %v1484_v9  ;;  %v1170_v39 = vpack.c.bf16 %v611_v32, %v610_v33  ;;  %v817_v30 = vld [vmem:[#allocation14 + $0x48] sm:$0xff]  ;;  %v836_v35 = vld [vmem:[#allocation14 + $0xd8] sm:$0xff] }
 0x177   :  { %v726_v55 = vpop.permute.xlu1 %725  ;;  %v721_v41 = vpop.permute.xlu0 %720 }
 0x178   :  { %v858_v42 = vadd.f32 %v842_v37, %v809_v36  ;;  %v857_v43 = vadd.f32 %v841_v38, %v808_v29  ;;  %v795_v44 = vmul.f32 %v1750_v16, %v726_v55  ;;  %v794_v45 = vmul.f32 %v1750_v16, %v721_v41  ;;  %v835_v29 = vld [vmem:[#allocation14 + $0xd0] sm:$0xff] }
 0x179   :  { %1171 = vmatpush3.bf16.msra.mxu1 %v1170_v39  ;;  %v818_v41 = vld [vmem:[#allocation14 + $0x50] sm:$0xff] }
 0x17a   :  { %v1173_v48 = vpack.c.bf16 %v858_v42, %v857_v43  ;;  %v844_v49 = vmul.f32 %v828_v40, %v795_v44  ;;  %v843_v50 = vmul.f32 %v827_v26, %v794_v45  ;;  %v819_v26 = vld [vmem:[#allocation14 + $0x58] sm:$0xff]  ;;  %v838_v45 = vld [vmem:[#allocation14 + $0xe8] sm:$0xff] }
 0x17b   :  { %v736_v52 = vpop.permute.xlu1 %735  ;;  %v731_v57 = vpop.permute.xlu0 %730 }
 0x17c   :  { %v860_v58 = vadd.f32 %v844_v49, %v811_v46  ;;  %v859_v59 = vadd.f32 %v843_v50, %v810_v47  ;;  %v797_v60 = vmul.f32 %v1750_v16, %v736_v52  ;;  %v796_v61 = vmul.f32 %v1750_v16, %v731_v57  ;;  %1174 = vmatpush3.bf16.msra.mxu0 %v1173_v48  ;;  %v837_v47 = vld [vmem:[#allocation14 + $0xe0] sm:$0xff] }
 0x17d   :  { %1175 = vmatprep.subr.bf16.mxu0 %v1484_v9  ;;  %v820_v57 = vld [vmem:[#allocation14 + $0x60] sm:$0xff] }
 0x17e   :  { %v1176_v0 = vpack.c.bf16 %v860_v58, %v859_v59  ;;  %v846_v1 = vmul.f32 %v830_v51, %v797_v60  ;;  %v845_v2 = vmul.f32 %v829_v56, %v796_v61  ;;  %v821_v56 = vld [vmem:[#allocation14 + $0x68] sm:$0xff]  ;;  %v840_v61 = vld [vmem:[#allocation14 + $0xf8] sm:$0xff] }
 0x17f   :  { %v746_v5 = vpop.permute.xlu1 %745  ;;  %v741_v7 = vpop.permute.xlu0 %740 }
 0x180   :  { %v862_v8 = vadd.f32 %v846_v1, %v813_v62  ;;  %v861_v10 = vadd.f32 %v845_v2, %v812_v63  ;;  %v799_v11 = vmul.f32 %v1750_v16, %v746_v5  ;;  %v798_v12 = vmul.f32 %v1750_v16, %v741_v7  ;;  %1177 = vmatpush3.bf16.msra.mxu0 %v1176_v0  ;;  %v839_v63 = vld [vmem:[#allocation14 + $0xf0] sm:$0xff] }
 0x181   :  { %1178 = vmatprep.subr.bf16.mxu0 %v1484_v9  ;;  %v822_v7 = vld [vmem:[#allocation14 + $0x70] sm:$0xff] }
 0x182   :  { %v1179_v17 = vpack.c.bf16 %v862_v8, %v861_v10  ;;  %v848_v18 = vmul.f32 %v832_v3, %v799_v11  ;;  %v847_v19 = vmul.f32 %v831_v6, %v798_v12  ;;  %v823_v6 = vld [vmem:[#allocation14 + $0x78] sm:$0xff] }
 0x183   :  { %v756_v21 = vpop.permute.xlu1 %755  ;;  %v751_v23 = vpop.permute.xlu0 %750 }
 0x184   :  { %v864_v24 = vadd.f32 %v848_v18, %v815_v13  ;;  %v863_v25 = vadd.f32 %v847_v19, %v814_v14  ;;  %v801_v27 = vmul.f32 %v1750_v16, %v756_v21  ;;  %v800_v28 = vmul.f32 %v1750_v16, %v751_v23  ;;  %1180 = vmatpush3.bf16.msra.mxu0 %v1179_v17  ;;  %v167_v17 = vld [vmem:[#allocation8 + $0x2] sm:$0x1]  ;;  %v166_v19 = vld [vmem:[#allocation8 + $0x1] sm:$0x1] }
 0x185   :  { %1181 = vmatprep.subr.bf16.mxu0 %v1484_v9  ;;  %v168_v18 = vmul.f32 %v167_v17, %v1689_v54 }
 0x186   :  { %v1182_v32 = vpack.c.bf16 %v864_v24, %v863_v25  ;;  %v850_v33 = vmul.f32 %v834_v20, %v801_v27  ;;  %v849_v34 = vmul.f32 %v833_v22, %v800_v28  ;;  %v428_v25 = vld [vmem:[#allocation13 + $0x2] sm:$0x1]  ;;  %v427_v28 = vld [vmem:[#allocation13 + $0x1] sm:$0x1] }
 0x187   :  { %v766_v36 = vpop.permute.xlu1 %765  ;;  %v761_v37 = vpop.permute.xlu0 %760  ;;  %v429_v27 = vmul.f32 %v428_v25, %v1713_v15 }
 0x188   :  { %v866_v38 = vadd.f32 %v850_v33, %v817_v30  ;;  %v865_v39 = vadd.f32 %v849_v34, %v816_v31  ;;  %v803_v40 = vmul.f32 %v1750_v16, %v766_v36  ;;  %v802_v55 = vmul.f32 %v1750_v16, %v761_v37  ;;  %1183 = vmatpush3.bf16.msra.mxu0 %v1182_v32  ;;  %v689_v34 = vld [vmem:[#allocation17 + $0x2] sm:$0x1]  ;;  %v688_v36 = vld [vmem:[#allocation17 + $0x1] sm:$0x1] }
 0x189   :  { %1184 = vmatprep.subr.bf16.mxu0 %v1484_v9  ;;  %v430_v30 = vadd.f32 %v429_v27, %v427_v28 }
 0x18a   :  { %v1185_v42 = vpack.c.bf16 %v866_v38, %v865_v39  ;;  %v852_v43 = vmul.f32 %v836_v35, %v803_v40  ;;  %v851_v44 = vmul.f32 %v835_v29, %v802_v55  ;;  %v690_v35 = vmul.f32 %v689_v34, %v1745_v4 }
 0x18b   :  { %v776_v46 = vpop.permute.xlu1 %775  ;;  %v771_v48 = vpop.permute.xlu0 %770 }
 0x18c   :  { %v868_v49 = vadd.f32 %v852_v43, %v819_v26  ;;  %v867_v50 = vadd.f32 %v851_v44, %v818_v41  ;;  %v805_v51 = vmul.f32 %v1750_v16, %v776_v46  ;;  %v804_v52 = vmul.f32 %v1750_v16, %v771_v48  ;;  %1186 = vmatpush3.bf16.msra.mxu0 %v1185_v42 }
 0x18d   :  { %1187 = vmatprep.subr.bf16.mxu0 %v1484_v9  ;;  %v691_v29 = vadd.f32 %v690_v35, %v688_v36 }
 0x18e   :  { %v1188_v58 = vpack.c.bf16 %v868_v49, %v867_v50  ;;  %v854_v59 = vmul.f32 %v838_v45, %v805_v51  ;;  %v853_v60 = vmul.f32 %v837_v47, %v804_v52 }
 0x18f   :  { %v786_v62 = vpop.permute.xlu1 %785  ;;  %v781_v0 = vpop.permute.xlu0 %780  ;;  %v876_v37 = vrot.slane %v691_v29, %v1687_v53 }
 0x190   :  { %v870_v1 = vadd.f32 %v854_v59, %v821_v56  ;;  %v869_v2 = vadd.f32 %v853_v60, %v820_v57  ;;  %v807_v3 = vmul.f32 %v1750_v16, %v786_v62  ;;  %v806_v5 = vmul.f32 %v1750_v16, %v781_v0  ;;  %1189 = vmatpush3.bf16.msra.mxu0 %v1188_v58 }
 0x191   :  { %1190 = vmatprep.subr.bf16.mxu0 %v1484_v9  ;;  %v169_v16 = vadd.f32 %v168_v18, %v166_v19 }
 0x192   :  { %v1191_v8 = vpack.c.bf16 %v870_v1, %v869_v2  ;;  %v856_v10 = vmul.f32 %v840_v61, %v807_v3  ;;  %v855_v11 = vmul.f32 %v839_v63, %v806_v5 }
 0x193   :  { %v354_v20 = vrot.slane %v169_v16, %v1687_v53 }
 0x194   :  { %v872_v12 = vadd.f32 %v856_v10, %v823_v6  ;;  %v871_v13 = vadd.f32 %v855_v11, %v822_v7  ;;  %1192 = vmatpush3.bf16.msra.mxu0 %v1191_v8 }
 0x195   :  { %1193 = vmatprep.subr.bf16.mxu0 %v1484_v9  ;;  %v615_v9 = vrot.slane %v430_v30, %v1687_v53 }
 0x196   :  { %v1194_v14 = vpack.c.bf16 %v872_v12, %v871_v13 }
 0x198   :  { %1195 = vmatpush3.bf16.msra.mxu0 %v1194_v14 }
 0x232   :  { %v421_v21 = vpop.f32.mrb[0].mxu0 }
 0x233   :  { %v422_v22 = vadd.f32 %v421_v21, %v354_v20  ;;  %v1053_v23 = vpop.f32.mrb[1].mxu0 }
 0x235   :  { %v425_v24 = vmax.f32 %v422_v22, 0.0 }
 0x237   :  { %1087 = vmatmul.mubr.f32.vlgmr.msra.gmra.mrb[0].mxu1 %v425_v24 }
 0x30a   :  { %v682_v31 = vpop.f32.mrb[0].mxu1 }
 0x30b   :  { %v683_v32 = vadd.f32 %v682_v31, %v615_v9  ;;  %v1088_v33 = vpop.f32.mrb[1].mxu1 }
 0x30d   :  { %v686_v54 = vmax.f32 %v683_v32, 0.0 }
 0x30f   :  { %1122 = vmatmul.mubr.f32.vlgmr.msra.gmra.mrb[2].mxu0 %v686_v54 }
 0x3e2   :  { %v943_v38 = vpop.f32.mrb[2].mxu0 }
 0x3e3   :  { %v944_v15 = vadd.f32 %v943_v38, %v876_v37  ;;  %v1123_v39 = vpop.f32.mrb[3].mxu0 }
 0x3e5   :  { %947 = vst [vmem:[#allocation19] sm:$0xff] %v944_v15 }
 0x3e6   :  { %1446 = shalt.err (!%p1443_p0)
}
 0x3e7   :  { %s1447_s4 = scalar_lea.hbm %s1807_s10, 128 }
 0x3e8   :  { %p1448_p1 = scmp.ne.s32.totalorder %s1807_s10, %s1447_s4  ;;  %p1451_p2 = scmp.lt.u32.totalorder %s1447_s4, %s1807_s10 }
 0x3ea   :  { %p1453_p3 = pnand %p1451_p2, %p1448_p1 }
 0x3ec   :  { %1456 = shalt.err (!%p1453_p3)
}
 0x3ed   :  { %957 = dma.vmem_to_hbm [thread:$0]  %s955_s24, 128, %s1807_s10, [#allocation4]  }
 0x3ee   :  { %1469 = dma.done.wait [#allocation4], 128  }
 0x3ef   :  { %1470 = vsyncadd [#allocation4], 4294967168 }
 0x3f0   :  { %961 = vsyncpa [#allocation3], 1 }
 0x3f1   :  { %962 = vsyncpa [#allocation6], 1 }
 0x3f2   :  { %963 = vsyncpa [#allocation9], 1 }
 0x3f3   :  { %964 = vsyncpa [#allocation12], 1 }
 0x3f4   :  { %965 = vsyncpa [#allocation15], 1 }
 0x3f5   :  { %966 = vsyncpa [#allocation18], 1 }
 0x3f6   :  { %967 = vsyncpa [#allocation4], 1 }

</bundles_post_ra>
